<compile_context>
chip_gen: v7x
topology: tpu7x:2x2x1
jax: 0.10.0
libtpu: 0.0.40
codegen_flags: <defaults>
</compile_context>

<pallas_src>
import functools

import jax
import jax.numpy as jnp
from jax import lax
from jax.experimental import pallas as pl
from jax.experimental.pallas import tpu as pltpu


def _frame_attention_kernel(x_ref, wq_ref, wkv_ref, wo_ref, bo_ref, o_ref, *,
                            heads, dim_head, scale, q_block):
    # x_ref  : (L, C)        full sequence for this batch element (resident
    #                        across the query-tile axis; channels on lanes)
    # wq_ref : (C, inner)    fused Q projection weights
    # wkv_ref: (C, 2*inner)  fused K|V projection weights (K cols then V cols)
    # wo_ref : (inner, C)    output projection weights
    # bo_ref : (1, C)        output projection bias
    # o_ref  : (TQ, C)       output tile for this (batch, query-tile)
    dtype = x_ref.dtype
    inner = heads * dim_head
    L = x_ref.shape[0]

    xf = x_ref[...]                                                     # (L, C)
    if q_block == L:
        xq = xf
    else:
        qi = pl.program_id(1)
        q_start = pl.multiple_of(qi * q_block, q_block)
        xq = x_ref[pl.ds(q_start, q_block), :]                          # (TQ, C)

    # Fused projections on the MXU: native-dtype operands, f32 accumulation.
    q_all = jnp.dot(xq, wq_ref[...], preferred_element_type=jnp.float32)
    q_all = (q_all * scale).astype(dtype)                               # (TQ, inner)
    # KV recomputed per query tile; the projection cost is minor next to the
    # O(L^2) attention once tiling actually kicks in.
    kv_all = jnp.dot(xf, wkv_ref[...],
                     preferred_element_type=jnp.float32).astype(dtype)  # (L, 2*inner)

    # Per-head attention on static lane slices of the fused qkv slabs.
    ctx_heads = []
    for h in range(heads):
        q = q_all[:, h * dim_head:(h + 1) * dim_head]                   # (TQ, D)
        k = kv_all[:, h * dim_head:(h + 1) * dim_head]                  # (L, D)
        v = kv_all[:, inner + h * dim_head:inner + (h + 1) * dim_head]  # (L, D)

        # dots[i, j] = sum_d q[i, d] * k[j, d]  (contract last dims).
        dots = lax.dot_general(q, k, (((1,), (1,)), ((), ())),
                               preferred_element_type=jnp.float32)      # (TQ, L)

        # Stable softmax; normalization deferred past the PV matmul.
        m = jnp.max(dots, axis=-1, keepdims=True)
        e = jnp.exp(dots - m)                                           # (TQ, L)
        denom = jnp.sum(e, axis=-1, keepdims=True)                      # (TQ, 1)

        o_h = jnp.dot(e.astype(dtype), v,
                      preferred_element_type=jnp.float32)               # (TQ, D)
        o_h = o_h * pl.reciprocal(denom, approx=True)                   # normalize
        ctx_heads.append(o_h)

    ctx = jnp.concatenate(ctx_heads, axis=-1).astype(dtype)             # (TQ, inner)

    # Single wide output projection + bias, f32 accumulate, one lane-dense
    # store per tile.
    out = jnp.dot(ctx, wo_ref[...], preferred_element_type=jnp.float32) # (TQ, C)
    o_ref[...] = (out + bo_ref[...].astype(jnp.float32)).astype(o_ref.dtype)


def frame_attention(x, wq, wkv, wo, bo, *, heads, dim_head, q_block=None):
    """FrameAttention forward.

    x   : (B, C, L)        torch Conv1d layout
    wq  : (inner, C)       to_q 1x1-conv weight (no bias)
    wkv : (2*inner, C)     to_kv 1x1-conv weight (k rows first, then v rows)
    wo  : (C, inner)       to_out 1x1-conv weight
    bo  : (C,)             to_out 1x1-conv bias
    returns (B, C, L)
    """
    B, C, L = x.shape
    inner = heads * dim_head
    scale = dim_head ** -0.5

    if q_block is None:
        q_block = 512 if (L % 512 == 0) else L
    assert L % q_block == 0
    n_qt = L // q_block

    # Layout plumbing outside the kernel: sequence on sublanes, channels on
    # lanes; fused, lane-wide weight slabs so the MXU N dim is inner/2*inner.
    x_t = jnp.transpose(x, (0, 2, 1))                                   # (B, L, C)
    wq_t = jnp.transpose(wq)                                            # (C, inner)
    wkv_t = jnp.transpose(wkv)                                          # (C, 2*inner)
    wo_t = jnp.transpose(wo)                                            # (inner, C)
    bo_r = bo.reshape(1, C)

    kernel = functools.partial(_frame_attention_kernel, heads=heads,
                               dim_head=dim_head, scale=scale,
                               q_block=q_block)

    out_t = pl.pallas_call(
        kernel,
        out_shape=jax.ShapeDtypeStruct((B, L, C), x.dtype),
        grid=(B, n_qt),
        in_specs=[
            pl.BlockSpec((None, L, C), lambda b, qi: (b, 0, 0)),         # x (resident over qi)
            pl.BlockSpec((C, inner), lambda b, qi: (0, 0)),              # wq
            pl.BlockSpec((C, 2 * inner), lambda b, qi: (0, 0)),          # wkv
            pl.BlockSpec((inner, C), lambda b, qi: (0, 0)),              # wo
            pl.BlockSpec((1, C), lambda b, qi: (0, 0)),                  # bias
        ],
        out_specs=pl.BlockSpec((None, q_block, C), lambda b, qi: (b, qi, 0)),
        compiler_params=pltpu.CompilerParams(
            dimension_semantics=("parallel", "parallel"),
            vmem_limit_bytes=64 * 1024 * 1024),
    )(x_t, wq_t, wkv_t, wo_t, bo_r)

    return jnp.transpose(out_t, (0, 2, 1))                               # (B, C, L)


if __name__ == "__main__":
    key = jax.random.PRNGKey(0)
    B, C, L = 2, 32, 16
    heads, dim_head = 4, 16
    inner = heads * dim_head

    k_x, k_q, k_kv, k_o, k_b = jax.random.split(key, 5)
    x = jax.random.normal(k_x, (B, C, L), dtype=jnp.float32)
    wq = jax.random.normal(k_q, (inner, C), dtype=jnp.float32) * 0.1
    wkv = jax.random.normal(k_kv, (2 * inner, C), dtype=jnp.float32) * 0.1
    wo = jax.random.normal(k_o, (C, inner), dtype=jnp.float32) * 0.1
    bo = jax.random.normal(k_b, (C,), dtype=jnp.float32) * 0.1

    out = frame_attention(x, wq, wkv, wo, bo, heads=heads, dim_head=dim_head)
    out = jax.block_until_ready(out)

    # Pure-JAX reference of the torch forward (dropout p=0.0 -> identity).
    def reference(x, wq, wkv, wo, bo):
        wk, wv = wkv[:inner], wkv[inner:]
        q = jnp.einsum('ic,bcl->bil', wq, x)
        k = jnp.einsum('ic,bcl->bil', wk, x)
        v = jnp.einsum('ic,bcl->bil', wv, x)

        def split_heads(t):  # (B, inner, L) -> (B*H, L, D)
            return t.reshape(B, heads, dim_head, L).transpose(0, 1, 3, 2).reshape(
                B * heads, L, dim_head)

        qh, kh, vh = map(split_heads, (q, k, v))
        dots = jnp.einsum('bid,bjd->bij', qh, kh) * (dim_head ** -0.5)
        attn = jax.nn.softmax(dots, axis=-1)
        oh = jnp.einsum('bij,bjd->bid', attn, vh)
        oc = oh.reshape(B, heads, L, dim_head).transpose(0, 1, 3, 2).reshape(
            B, inner, L)
        return jnp.einsum('ci,bil->bcl', wo, oc) + bo[None, :, None]

    ref = reference(x, wq, wkv, wo, bo)
    err = float(jnp.max(jnp.abs(out - ref)))
    # Tolerance accounts for the EUP approximate reciprocal in the softmax
    # normalization (and leaves headroom for bf16 inputs).
    assert jnp.allclose(out, ref, atol=2e-3, rtol=2e-3), f"max abs err {err}"

    print("KERNEL_OK")
</pallas_src>

<mosaic_0001>
module attributes {stable_mosaic.version = 11 : i64} {
  func.func @_frame_attention_kernel(%arg0: i32, %arg1: i32, %arg2: memref<1x16x32xf32, #tpu.memory_space<vmem>>, %arg3: memref<32x64xf32, #tpu.memory_space<vmem>>, %arg4: memref<32x128xf32, #tpu.memory_space<vmem>>, %arg5: memref<64x32xf32, #tpu.memory_space<vmem>>, %arg6: memref<1x32xf32, #tpu.memory_space<vmem>>, %arg7: memref<1x16x32xf32, #tpu.memory_space<vmem>>) attributes {dimension_semantics = [#tpu.dimension_semantics<parallel>, #tpu.dimension_semantics<parallel>], iteration_bounds = array<i64: 2, 1>, scalar_prefetch = 0 : i64, scratch_operands = 0 : i64, tpu.core_type = #tpu.core_type<tc>, window_params = [{transform_indices = @transform_0, window_bounds = array<i64: 1, 16, 32>}, {pipeline_mode = #tpu.pipeline_mode<synchronous>, transform_indices = @transform_1, window_bounds = array<i64: 32, 64>}, {pipeline_mode = #tpu.pipeline_mode<synchronous>, transform_indices = @transform_2, window_bounds = array<i64: 32, 128>}, {pipeline_mode = #tpu.pipeline_mode<synchronous>, transform_indices = @transform_3, window_bounds = array<i64: 64, 32>}, {pipeline_mode = #tpu.pipeline_mode<synchronous>, transform_indices = @transform_4, window_bounds = array<i64: 1, 32>}, {transform_indices = @transform_5, window_bounds = array<i64: 1, 16, 32>}]} {
    %c0 = arith.constant 0 : index
    %c0_0 = arith.constant 0 : index
    %c0_1 = arith.constant 0 : index
    %0 = vector.load %arg2[%c0, %c0_0, %c0_1] : memref<1x16x32xf32, #tpu.memory_space<vmem>>, vector<1x16x32xf32>
    %1 = vector.shape_cast %0 : vector<1x16x32xf32> to vector<16x32xf32>
    %c0_2 = arith.constant 0 : index
    %c0_3 = arith.constant 0 : index
    %2 = vector.load %arg3[%c0_2, %c0_3] : memref<32x64xf32, #tpu.memory_space<vmem>>, vector<32x64xf32>
    %cst = arith.constant dense<0.000000e+00> : vector<16x64xf32>
    %3 = tpu.matmul %1, %2, %cst {dimension_numbers = #tpu.dot_dimension_numbers<[1], [0], [0], [1], [0, 0, 1, 1], [], []>} : vector<16x32xf32>, vector<32x64xf32>, vector<16x64xf32> -> vector<16x64xf32>
    %cst_4 = arith.constant 2.500000e-01 : f32
    %4 = vector.broadcast %cst_4 : f32 to vector<16x64xf32>
    %5 = arith.mulf %3, %4 : vector<16x64xf32>
    %c0_5 = arith.constant 0 : index
    %c0_6 = arith.constant 0 : index
    %6 = vector.load %arg4[%c0_5, %c0_6] : memref<32x128xf32, #tpu.memory_space<vmem>>, vector<32x128xf32>
    %cst_7 = arith.constant dense<0.000000e+00> : vector<16x128xf32>
    %7 = tpu.matmul %1, %6, %cst_7 {dimension_numbers = #tpu.dot_dimension_numbers<[1], [0], [0], [1], [0, 0, 1, 1], [], []>} : vector<16x32xf32>, vector<32x128xf32>, vector<16x128xf32> -> vector<16x128xf32>
    %8 = vector.extract_strided_slice %5 {offsets = [0, 0], sizes = [16, 16], strides = [1, 1]} : vector<16x64xf32> to vector<16x16xf32>
    %9 = vector.extract_strided_slice %7 {offsets = [0, 0], sizes = [16, 16], strides = [1, 1]} : vector<16x128xf32> to vector<16x16xf32>
    %10 = vector.extract_strided_slice %7 {offsets = [0, 64], sizes = [16, 16], strides = [1, 1]} : vector<16x128xf32> to vector<16x16xf32>
    %cst_8 = arith.constant dense<0.000000e+00> : vector<16x16xf32>
    %11 = tpu.matmul %8, %9, %cst_8 {dimension_numbers = #tpu.dot_dimension_numbers<[1], [1], [0], [0], [0, 0, 1, 0], [], []>} : vector<16x16xf32>, vector<16x16xf32>, vector<16x16xf32> -> vector<16x16xf32>
    %cst_9 = arith.constant dense<0xFF800000> : vector<16xf32>
    %12 = vector.multi_reduction <maximumf>, %11, %cst_9 [1] : vector<16x16xf32> to vector<16xf32>
    %13 = vector.shape_cast %12 : vector<16xf32> to vector<16x1xf32>
    %14 = vector.broadcast %13 : vector<16x1xf32> to vector<16x16xf32>
    %15 = arith.subf %11, %14 : vector<16x16xf32>
    %16 = math.exp %15 : vector<16x16xf32>
    %cst_10 = arith.constant dense<0.000000e+00> : vector<16xf32>
    %17 = vector.multi_reduction <add>, %16, %cst_10 [1] : vector<16x16xf32> to vector<16xf32>
    %18 = vector.shape_cast %17 : vector<16xf32> to vector<16x1xf32>
    %cst_11 = arith.constant dense<0.000000e+00> : vector<16x16xf32>
    %19 = tpu.matmul %16, %10, %cst_11 {dimension_numbers = #tpu.dot_dimension_numbers<[1], [0], [0], [1], [0, 0, 1, 1], [], []>} : vector<16x16xf32>, vector<16x16xf32>, vector<16x16xf32> -> vector<16x16xf32>
    %20 = tpu.reciprocal %18 {approx = true} : vector<16x1xf32> -> vector<16x1xf32>
    %21 = vector.broadcast %20 : vector<16x1xf32> to vector<16x16xf32>
    %22 = arith.mulf %19, %21 : vector<16x16xf32>
    %23 = vector.extract_strided_slice %5 {offsets = [0, 16], sizes = [16, 16], strides = [1, 1]} : vector<16x64xf32> to vector<16x16xf32>
    %24 = vector.extract_strided_slice %7 {offsets = [0, 16], sizes = [16, 16], strides = [1, 1]} : vector<16x128xf32> to vector<16x16xf32>
    %25 = vector.extract_strided_slice %7 {offsets = [0, 80], sizes = [16, 16], strides = [1, 1]} : vector<16x128xf32> to vector<16x16xf32>
    %cst_12 = arith.constant dense<0.000000e+00> : vector<16x16xf32>
    %26 = tpu.matmul %23, %24, %cst_12 {dimension_numbers = #tpu.dot_dimension_numbers<[1], [1], [0], [0], [0, 0, 1, 0], [], []>} : vector<16x16xf32>, vector<16x16xf32>, vector<16x16xf32> -> vector<16x16xf32>
    %cst_13 = arith.constant dense<0xFF800000> : vector<16xf32>
    %27 = vector.multi_reduction <maximumf>, %26, %cst_13 [1] : vector<16x16xf32> to vector<16xf32>
    %28 = vector.shape_cast %27 : vector<16xf32> to vector<16x1xf32>
    %29 = vector.broadcast %28 : vector<16x1xf32> to vector<16x16xf32>
    %30 = arith.subf %26, %29 : vector<16x16xf32>
    %31 = math.exp %30 : vector<16x16xf32>
    %cst_14 = arith.constant dense<0.000000e+00> : vector<16xf32>
    %32 = vector.multi_reduction <add>, %31, %cst_14 [1] : vector<16x16xf32> to vector<16xf32>
    %33 = vector.shape_cast %32 : vector<16xf32> to vector<16x1xf32>
    %cst_15 = arith.constant dense<0.000000e+00> : vector<16x16xf32>
    %34 = tpu.matmul %31, %25, %cst_15 {dimension_numbers = #tpu.dot_dimension_numbers<[1], [0], [0], [1], [0, 0, 1, 1], [], []>} : vector<16x16xf32>, vector<16x16xf32>, vector<16x16xf32> -> vector<16x16xf32>
    %35 = tpu.reciprocal %33 {approx = true} : vector<16x1xf32> -> vector<16x1xf32>
    %36 = vector.broadcast %35 : vector<16x1xf32> to vector<16x16xf32>
    %37 = arith.mulf %34, %36 : vector<16x16xf32>
    %38 = vector.extract_strided_slice %5 {offsets = [0, 32], sizes = [16, 16], strides = [1, 1]} : vector<16x64xf32> to vector<16x16xf32>
    %39 = vector.extract_strided_slice %7 {offsets = [0, 32], sizes = [16, 16], strides = [1, 1]} : vector<16x128xf32> to vector<16x16xf32>
    %40 = vector.extract_strided_slice %7 {offsets = [0, 96], sizes = [16, 16], strides = [1, 1]} : vector<16x128xf32> to vector<16x16xf32>
    %cst_16 = arith.constant dense<0.000000e+00> : vector<16x16xf32>
    %41 = tpu.matmul %38, %39, %cst_16 {dimension_numbers = #tpu.dot_dimension_numbers<[1], [1], [0], [0], [0, 0, 1, 0], [], []>} : vector<16x16xf32>, vector<16x16xf32>, vector<16x16xf32> -> vector<16x16xf32>
    %cst_17 = arith.constant dense<0xFF800000> : vector<16xf32>
    %42 = vector.multi_reduction <maximumf>, %41, %cst_17 [1] : vector<16x16xf32> to vector<16xf32>
    %43 = vector.shape_cast %42 : vector<16xf32> to vector<16x1xf32>
    %44 = vector.broadcast %43 : vector<16x1xf32> to vector<16x16xf32>
    %45 = arith.subf %41, %44 : vector<16x16xf32>
    %46 = math.exp %45 : vector<16x16xf32>
    %cst_18 = arith.constant dense<0.000000e+00> : vector<16xf32>
    %47 = vector.multi_reduction <add>, %46, %cst_18 [1] : vector<16x16xf32> to vector<16xf32>
    %48 = vector.shape_cast %47 : vector<16xf32> to vector<16x1xf32>
    %cst_19 = arith.constant dense<0.000000e+00> : vector<16x16xf32>
    %49 = tpu.matmul %46, %40, %cst_19 {dimension_numbers = #tpu.dot_dimension_numbers<[1], [0], [0], [1], [0, 0, 1, 1], [], []>} : vector<16x16xf32>, vector<16x16xf32>, vector<16x16xf32> -> vector<16x16xf32>
    %50 = tpu.reciprocal %48 {approx = true} : vector<16x1xf32> -> vector<16x1xf32>
    %51 = vector.broadcast %50 : vector<16x1xf32> to vector<16x16xf32>
    %52 = arith.mulf %49, %51 : vector<16x16xf32>
    %53 = vector.extract_strided_slice %5 {offsets = [0, 48], sizes = [16, 16], strides = [1, 1]} : vector<16x64xf32> to vector<16x16xf32>
    %54 = vector.extract_strided_slice %7 {offsets = [0, 48], sizes = [16, 16], strides = [1, 1]} : vector<16x128xf32> to vector<16x16xf32>
    %55 = vector.extract_strided_slice %7 {offsets = [0, 112], sizes = [16, 16], strides = [1, 1]} : vector<16x128xf32> to vector<16x16xf32>
    %cst_20 = arith.constant dense<0.000000e+00> : vector<16x16xf32>
    %56 = tpu.matmul %53, %54, %cst_20 {dimension_numbers = #tpu.dot_dimension_numbers<[1], [1], [0], [0], [0, 0, 1, 0], [], []>} : vector<16x16xf32>, vector<16x16xf32>, vector<16x16xf32> -> vector<16x16xf32>
    %cst_21 = arith.constant dense<0xFF800000> : vector<16xf32>
    %57 = vector.multi_reduction <maximumf>, %56, %cst_21 [1] : vector<16x16xf32> to vector<16xf32>
    %58 = vector.shape_cast %57 : vector<16xf32> to vector<16x1xf32>
    %59 = vector.broadcast %58 : vector<16x1xf32> to vector<16x16xf32>
    %60 = arith.subf %56, %59 : vector<16x16xf32>
    %61 = math.exp %60 : vector<16x16xf32>
    %cst_22 = arith.constant dense<0.000000e+00> : vector<16xf32>
    %62 = vector.multi_reduction <add>, %61, %cst_22 [1] : vector<16x16xf32> to vector<16xf32>
    %63 = vector.shape_cast %62 : vector<16xf32> to vector<16x1xf32>
    %cst_23 = arith.constant dense<0.000000e+00> : vector<16x16xf32>
    %64 = tpu.matmul %61, %55, %cst_23 {dimension_numbers = #tpu.dot_dimension_numbers<[1], [0], [0], [1], [0, 0, 1, 1], [], []>} : vector<16x16xf32>, vector<16x16xf32>, vector<16x16xf32> -> vector<16x16xf32>
    %65 = tpu.reciprocal %63 {approx = true} : vector<16x1xf32> -> vector<16x1xf32>
    %66 = vector.broadcast %65 : vector<16x1xf32> to vector<16x16xf32>
    %67 = arith.mulf %64, %66 : vector<16x16xf32>
    %68 = tpu.concatenate %22, %37, %52, %67 in 1 : vector<16x16xf32>, vector<16x16xf32>, vector<16x16xf32>, vector<16x16xf32> -> vector<16x64xf32>
    %c0_24 = arith.constant 0 : index
    %c0_25 = arith.constant 0 : index
    %69 = vector.load %arg5[%c0_24, %c0_25] : memref<64x32xf32, #tpu.memory_space<vmem>>, vector<64x32xf32>
    %cst_26 = arith.constant dense<0.000000e+00> : vector<16x32xf32>
    %70 = tpu.matmul %68, %69, %cst_26 {dimension_numbers = #tpu.dot_dimension_numbers<[1], [0], [0], [1], [0, 0, 1, 1], [], []>} : vector<16x64xf32>, vector<64x32xf32>, vector<16x32xf32> -> vector<16x32xf32>
    %c0_27 = arith.constant 0 : index
    %c0_28 = arith.constant 0 : index
    %71 = vector.load %arg6[%c0_27, %c0_28] : memref<1x32xf32, #tpu.memory_space<vmem>>, vector<1x32xf32>
    %72 = vector.broadcast %71 : vector<1x32xf32> to vector<16x32xf32>
    %73 = arith.addf %70, %72 : vector<16x32xf32>
    %c0_29 = arith.constant 0 : index
    %c0_30 = arith.constant 0 : index
    %c0_31 = arith.constant 0 : index
    %74 = vector.load %arg7[%c0_29, %c0_30, %c0_31] : memref<1x16x32xf32, #tpu.memory_space<vmem>>, vector<1x16x32xf32>
    %75 = vector.shape_cast %74 : vector<1x16x32xf32> to vector<16x32xf32>
    %76 = vector.shape_cast %73 : vector<16x32xf32> to vector<1x16x32xf32>
    tpu.vector_store %arg7[%c0_29, %c0_30, %c0_31], %76 {strides = array<i32>} : memref<1x16x32xf32, #tpu.memory_space<vmem>>, vector<1x16x32xf32>,
    return
  }
  func.func @transform_0(%arg0: i32, %arg1: i32) -> (i32, i32, i32) {
    %c0_i32 = arith.constant 0 : i32
    %c0_i32_0 = arith.constant 0 : i32
    %c0_i32_1 = arith.constant 0 : i32
    return %arg0, %c0_i32, %c0_i32_0 : i32, i32, i32
  }
  func.func @transform_1(%arg0: i32, %arg1: i32) -> (i32, i32) {
    %c0_i32 = arith.constant 0 : i32
    %c0_i32_0 = arith.constant 0 : i32
    %c0_i32_1 = arith.constant 0 : i32
    return %c0_i32, %c0_i32_0 : i32, i32
  }
  func.func @transform_2(%arg0: i32, %arg1: i32) -> (i32, i32) {
    %c0_i32 = arith.constant 0 : i32
    %c0_i32_0 = arith.constant 0 : i32
    %c0_i32_1 = arith.constant 0 : i32
    return %c0_i32, %c0_i32_0 : i32, i32
  }
  func.func @transform_3(%arg0: i32, %arg1: i32) -> (i32, i32) {
    %c0_i32 = arith.constant 0 : i32
    %c0_i32_0 = arith.constant 0 : i32
    %c0_i32_1 = arith.constant 0 : i32
    return %c0_i32, %c0_i32_0 : i32, i32
  }
  func.func @transform_4(%arg0: i32, %arg1: i32) -> (i32, i32) {
    %c0_i32 = arith.constant 0 : i32
    %c0_i32_0 = arith.constant 0 : i32
    %c0_i32_1 = arith.constant 0 : i32
    return %c0_i32, %c0_i32_0 : i32, i32
  }
  func.func @transform_5(%arg0: i32, %arg1: i32) -> (i32, i32, i32) {
    %c0_i32 = arith.constant 0 : i32
    %c0_i32_0 = arith.constant 0 : i32
    return %arg0, %arg1, %c0_i32 : i32, i32, i32
  }
}

</mosaic_0001>

<bundles_post_ra>
// kernel: tpu_custom_call.1
= control target key start
LH: loop header
LB: loop body
LE: loop exit
PB: predicated region body
PF: predicated region fallthrough
CT: control target
= control target key end

     0   :  { %10 = vsyncpa [#allocation3], 0  ;;  %s2720_s0 = inlined_call_operand.hbm [shape: f32[2,16,32], index: 0, kind: input, shape index: {}]   ;;  %s2721_s1 = inlined_call_operand.hbm [shape: f32[32,64], index: 1, kind: input, shape index: {}]   ;;  %s2722_s2 = inlined_call_operand.hbm [shape: f32[32,128], index: 2, kind: input, shape index: {}]   ;;  %s2723_s3 = inlined_call_operand.hbm [shape: f32[64,32], index: 3, kind: input, shape index: {}]   ;;  %s2724_s4 = inlined_call_operand.hbm [shape: f32[1,32], index: 4, kind: input, shape index: {}]   ;;  %s2725_s5 = inlined_call_operand.hbm [shape: f32[2,16,32], index: 5, kind: output, shape index: {}]  }
   0x1   :  { %12 = vsyncpa [#allocation3 + $0x1], 0 }
   0x2   :  { %13 = vsyncpa [#allocation6], 0 }
   0x3   :  { %14 = vsyncpa [#allocation9], 0 }
   0x4   :  { %15 = vsyncpa [#allocation4], 0 }
   0x5   :  { %17 = vsyncpa [#allocation4 + $0x1], 0  ;;  %s2289_s18 = smov 0   ;;  %s2291_s19 = smov 0  }
   0x6   :  { %s2293_s20 = smov 0   ;;  %s2295_s21 = smov 0  }
   0x7   :  { %s2297_s22 = smov 0   ;;  %s2299_s23 = smov 0  }
   0x8 LB: > { %2732 = sst [smem:[#allocation16_spill]] %s2220_s18  ;;  %s1548_s24 = sadd.s32 4294967295, %s2240_s23   ;;  %s2240_s23 = sphi %s2299_s23, %s23_s23   ;;  %s2236_s22 = sphi %s2297_s22, %s2757_s22   ;;  %s2232_s21 = sphi %s2295_s21, %s2756_s21   ;;  %s2228_s20 = sphi %s2293_s20, %s2755_s20   ;;  %s2224_s19 = sphi %s2291_s19, %s2754_s19   ;;  %s2220_s18 = sphi %s2289_s18, %s2753_s18  }
   0x9   : > { %s1549_s25 = sadd.s32 4294967294, %s2240_s23   ;;  %p55_p0 = scmp.ne.s32.totalorder %s2224_s19, %s2220_s18 }
   0xa   : > { %p2323_p1 = scmp.eq.s32.totalorder %s1548_s24, 0  ;;  %p2327_p2 = scmp.eq.s32.totalorder %s1548_s24, 1 }
   0xb   : > { %p171_p3 = scmp.eq.s32.totalorder %s1549_s25, 1  ;;  %p1550_p5 = scmp.ge.s32.totalorder %s2240_s23, 1 }
   0xc   : > { %s2733_s26 = scalar_select %p2323_p1, 1, 0 }
   0xd   : > { %s2734_s27 = scalar_select %p2327_p2, 1, 0 }
   0xe   : > { %p2333_p4 = por %p2323_p1, %p55_p0  ;;  %p2338_p6 = por %p171_p3, %p55_p0 }
   0xf   : > { %p178_p7 = scmp.lt.s32.totalorder %s2240_s23, 3  ;;  %s2242_s6 = smov [#allocation5]  }
  0x10   : > { %s2735_s28 = scalar_select %p2333_p4, 1, 0 }
  0x11   : > { %s2736_s29 = scalar_select %p2338_p6, 1, 0 }
  0x12   : > { %p2343_p8 = pnand %p1550_p5, %p178_p7  ;;  %s190_s7 = sshll.u32 %s2242_s6, 4  ;;  %s2347_s7 = int_to_ptr.vmem [resolvable:$true] %s190_s7 }
  0x13   : > { %2737 = sst [smem:[#allocation17_spill]] %s2736_s29  ;;  %s2243_s9 = smov [#allocation8]  }
  0x14   : > { %s2738_s30 = scalar_select %p2343_p8, 1, 0 }
  0x15   : > { %p1847_p9 = pneg %p2343_p8  ;;  %s216_s10 = sshll.u32 %s2243_s9, 4  ;;  %s2358_s10 = int_to_ptr.vmem [resolvable:$true] %s216_s10 }
  0x16   : > { %s2244_s11 = smov [#allocation7]   ;;  %s2008_s15 = scalar_lea.hbm %s2721_s1, 512 }
  0x17   : > { %p2354_p11 = pnand %p1847_p9, %p2323_p1  ;;  %s2360_s12 = sshll.u32 %s2244_s11, 4  ;;  %s204_s12 = int_to_ptr.vmem [resolvable:$true] %s2360_s12 }
  0x18   : > { %p2009_p12 = scmp.ne.s32.totalorder %s2721_s1, %s2008_s15  ;;  %p2015_p5 = scmp.lt.u32.totalorder %s2008_s15, %s2721_s1 }
  0x19   : > { %p2370_p13 = pneg %p2354_p11 }
  0x1b   : > { %p2011_p0 = pnand %p2370_p13, %p2009_p12 }
  0x1d   : > { %p2012_p3 = pneg %p2011_p0 }
  0x1f   : > { %p2017_p7 = pnand %p2015_p5, %p2012_p3 }
  0x21   : > { %2020 = shalt.err (!%p2017_p7)
}
  0x22   : > { %s2021_s9 = scalar_lea.vmem %s2347_s7, 512  ;;  %p2029_p1 = scmp.lt.s32.totalorder %s2347_s7, %s2347_s7 }
  0x23   : > { %p2022_p9 = scmp.ne.s32.totalorder %s2347_s7, %s2021_s9  ;;  %p2030_p4 = scmp.lt.s32.totalorder %s2021_s9, %s2021_s9 }
  0x25   : > { %p2024_p10 = pnand %p2022_p9, %p2370_p13  ;;  %p2031_p12 = por %p2030_p4, %p2029_p1 }
  0x27   : > { %p2025_p6 = pneg %p2024_p10 }
  0x29   : > { %p2032_p0 = pnand %p2031_p12, %p2025_p6 }
  0x2b   : > { %2035 = shalt.err (!%p2032_p0)
}
  0x2c   : > { %s2245_s11 = smov 128   ;;  %s2246_s13 = smov 8  }
  0x2d   : > { %1850 = dma.hbm_to_vmem [thread:$0]  (!%p2354_p11), %s2721_s1, 512, %s2347_s7, [#allocation6], %s2245_s11, %s2245_s11, %s2246_s13  }
  0x2e   : > { %s2036_s25 = scalar_lea.hbm %s2723_s3, 1024 }
  0x2f   : > { %p2037_p1 = scmp.ne.s32.totalorder %s2723_s3, %s2036_s25  ;;  %p2043_p10 = scmp.lt.u32.totalorder %s2036_s25, %s2723_s3 }
  0x31   : > { %p2039_p4 = pnand %p2037_p1, %p2370_p13 }
  0x33   : > { %p2040_p6 = pneg %p2039_p4 }
  0x35   : > { %p2045_p3 = pnand %p2043_p10, %p2040_p6 }
  0x37   : > { %2048 = shalt.err (!%p2045_p3)
}
  0x38   : > { %s2049_s7 = scalar_lea.vmem %s2358_s10, 1024  ;;  %p2057_p12 = scmp.lt.s32.totalorder %s2358_s10, %s2358_s10 }
  0x39   : > { %p2050_p5 = scmp.ne.s32.totalorder %s2358_s10, %s2049_s7  ;;  %p2058_p0 = scmp.lt.s32.totalorder %s2049_s7, %s2049_s7 }
  0x3b   : > { %p2052_p7 = pnand %p2050_p5, %p2370_p13  ;;  %p2059_p1 = por %p2058_p0, %p2057_p12 }
  0x3d   : > { %p2053_p9 = pneg %p2052_p7 }
  0x3f   : > { %p2060_p4 = pnand %p2059_p1, %p2053_p9 }
  0x41   : > { %2063 = shalt.err (!%p2060_p4)
}
  0x42   : > { %1856 = dma.hbm_to_vmem [thread:$0]  (!%p2354_p11), %s2723_s3, 1024, %s2358_s10, [#allocation9], %s2245_s11, %s2245_s11, %s2246_s13  }
  0x43   : > { %s2064_s16 = scalar_lea.hbm %s2722_s2, 512 }
  0x44   : > { %p2065_p6 = scmp.ne.s32.totalorder %s2722_s2, %s2064_s16  ;;  %p2071_p5 = scmp.lt.u32.totalorder %s2064_s16, %s2722_s2 }
  0x46   : > { %p2067_p10 = pnand %p2065_p6, %p2370_p13 }
  0x48   : > { %p2068_p3 = pneg %p2067_p10 }
  0x4a   : > { %p2073_p7 = pnand %p2071_p5, %p2068_p3 }
  0x4c   : > { %2076 = shalt.err (!%p2073_p7)
}
  0x4d   : > { %s2077_s7 = scalar_lea.vmem %s204_s12, 512  ;;  %p2085_p1 = scmp.lt.s32.totalorder %s204_s12, %s204_s12 }
  0x4e   : > { %p2078_p9 = scmp.ne.s32.totalorder %s204_s12, %s2077_s7  ;;  %p2086_p4 = scmp.lt.s32.totalorder %s2077_s7, %s2077_s7 }
  0x50   : > { %p2080_p12 = pnand %p2078_p9, %p2370_p13  ;;  %p2087_p8 = por %p2086_p4, %p2085_p1 }
  0x52   : > { %p2081_p0 = pneg %p2080_p12 }
  0x54   : > { %p2088_p2 = pnand %p2087_p8, %p2081_p0 }
  0x56   : > { %2091 = shalt.err (!%p2088_p2)
}
  0x57   : > { %1853 = dma.hbm_to_vmem [thread:$0]  (!%p2354_p11), %s2722_s2, 512, %s204_s12, [#allocation6], %s2245_s11, %s2245_s11, %s2246_s13  }
  0x58   : > { %s2247_s29 = smov [#allocation10]   ;;  %s2092_s17 = scalar_lea.hbm %s2724_s4, 16 }
  0x59   : > { %s230_s14 = sshll.u32 %s2247_s29, 4  ;;  %p2093_p2 = scmp.ne.s32.totalorder %s2724_s4, %s2092_s17  ;;  %s231_s14 = int_to_ptr.vmem [resolvable:$true] %s230_s14 }
  0x5a   : > { %p2099_p10 = scmp.lt.u32.totalorder %s2092_s17, %s2724_s4 }
  0x5b   : > { %p2095_p8 = pnand %p2093_p2, %p2370_p13 }
  0x5d   : > { %p2096_p6 = pneg %p2095_p8 }
  0x5f   : > { %p2101_p3 = pnand %p2099_p10, %p2096_p6 }
  0x61   : > { %2104 = shalt.err (!%p2101_p3)
}
  0x62   : > { %s2105_s12 = scalar_lea.vmem %s231_s14, 16  ;;  %s2112_s10 = scalar_lea.vmem %s231_s14, 32 }
  0x63   : > { %p2106_p5 = scmp.ne.s32.totalorder %s231_s14, %s2105_s12  ;;  %p2113_p12 = scmp.lt.s32.totalorder %s231_s14, %s231_s14 }
  0x64   : > { %p2114_p0 = scmp.lt.s32.totalorder %s2112_s10, %s2105_s12 }
  0x65   : > { %p2108_p7 = pnand %p2106_p5, %p2370_p13 }
  0x66   : > { %p2115_p1 = por %p2114_p0, %p2113_p12 }
  0x67   : > { %p2109_p9 = pneg %p2108_p7 }
  0x69   : > { %p2116_p4 = pnand %p2115_p1, %p2109_p9 }
  0x6b   : > { %2119 = shalt.err (!%p2116_p4)
}
  0x6c   : > { %1859 = dma.hbm_to_vmem [thread:$0]  (!%p2354_p11), %s2724_s4, 16, %s231_s14, [#allocation9]  }
  0x6d   : > { %s35_s24 = sadd.s32 1, %s2236_s22  ;;  %s42_s15 = sadd.s32 1, %s2228_s20 }
  0x6e   : > { %p37_p13 = scmp.ge.s32.totalorder %s35_s24, 2  ;;  %p49_p2 = scmp.ne.s32.totalorder %s2228_s20, %s2224_s19 }
  0x6f   : > { %p50_p8 = scmp.eq.s32.totalorder %s2240_s23, 0  ;;  %p1872_p6 = scmp.lt.s32.totalorder %s2240_s23, 2 }
  0x70   : > { %s2759_s24 = smov (%p37_p13, %s35_s24), 0  ;;  %p2741_p3 = scmp.ne.s32.totalorder %s2734_s27, 0 }
  0x71   : > { %p51_p10 = por %p50_p8, %p49_p2  ;;  %s39_s16 = ssub.s32 %s2236_s22, %s2759_s24 }
  0x72   : > { %p2470_p5 = por %p2741_p3, %p49_p2  ;;  %s241_s17 = sand.u32 1, %s2228_s20  }
  0x73   : > { %p40_p7 = scmp.eq.s32.totalorder %s39_s16, 0  ;;  %s1556_s14 = sshll.u32 %s241_s17, 4 }
  0x74   : > { %s1602_s25 = sshll.u32 %s2236_s22, 8  ;;  %s245_s27 = scalar_lea.vmem [#allocation2], %s1556_s14 }
  0x75   : > { %s2479_s6 = scalar_select %p40_p7, %s2228_s20, %s42_s15  }
  0x76   : > { %s2484_s12 = scalar_lea.hbm %s2720_s0, %s1602_s25  ;;  %s252_s10 = sshll.u32 %s245_s27, 4  ;;  %s2492_s10 = int_to_ptr.vmem [resolvable:$true] %s252_s10 }
  0x77   : > { %p2488_p11 = pnand %p1872_p6, %p51_p10  ;;  %s2494_s29 = scalar_lea.sflag [#allocation3], %s241_s17 }
  0x78   : > { %s2120_s15 = scalar_lea.hbm %s2484_s12, 256  ;;  %s2125_s25 = scalar_lea.hbm %s2720_s0, 512 }
  0x79   : > { %p2121_p9 = scmp.ne.s32.totalorder %s2484_s12, %s2120_s15  ;;  %p2122_p12 = pneg %p2488_p11 }
  0x7a   : > { %p2126_p4 = scmp.lt.u32.totalorder %s2484_s12, %s2720_s0  ;;  %p2127_p13 = scmp.lt.u32.totalorder %s2125_s25, %s2120_s15 }
  0x7b   : > { %p2123_p0 = pnand %p2122_p12, %p2121_p9  ;;  %p2129_p8 = scmp.lt.u32.totalorder %s2120_s15, %s2484_s12 }
  0x7c   : > { %p2128_p2 = por %p2127_p13, %p2126_p4 }
  0x7d   : > { %p2124_p1 = pneg %p2123_p0 }
  0x7e   : > { %p2130_p6 = por %p2129_p8, %p2128_p2 }
  0x80   : > { %p2131_p10 = pnand %p2130_p6, %p2124_p1 }
  0x82   : > { %2134 = shalt.err (!%p2131_p10)
}
  0x83   : > { %s2135_s17 = scalar_lea.vmem %s2492_s10, 256  ;;  %s2248_s27 = smov [#allocation2]  }
  0x84   : > { %p2136_p3 = scmp.ne.s32.totalorder %s2492_s10, %s2135_s17  ;;  %s2140_s16 = sshll.u32 %s2248_s27, 4  ;;  %s2141_s16 = int_to_ptr.vmem [resolvable:$false] %s2140_s16 }
  0x85   : > { %s2142_s14 = scalar_lea.vmem %s2141_s16, 512  ;;  %p2143_p0 = scmp.lt.s32.totalorder %s2492_s10, %s2141_s16 }
  0x86   : > { %p2138_p7 = pnand %p2136_p3, %p2122_p12  ;;  %p2144_p4 = scmp.lt.s32.totalorder %s2142_s14, %s2135_s17 }
  0x88   : > { %p2139_p9 = pneg %p2138_p7  ;;  %p2145_p13 = por %p2144_p4, %p2143_p0 }
  0x8a   : > { %p2146_p2 = pnand %p2145_p13, %p2139_p9 }
  0x8c   : > { %2149 = shalt.err (!%p2146_p2)
}
  0x8d   : > { %1863 = dma.hbm_to_vmem [thread:$0]  (!%p2488_p11), %s2484_s12, 256, %s2492_s10, %s2494_s29, %s2245_s11, %s2245_s11, %s2246_s13  }
  0x8e   : > { %p2744_p12 = scmp.ne.s32.totalorder %s2738_s30, 0 }
  0x8f   : > { %s2528_s15 = sand.u32 (!%p2744_p12), 1, %s2224_s19   ;;  %p2745_p1 = scmp.ne.s32.totalorder (!%p2744_p12), %s2735_s28, 0 }
  0x90   : > { %264 = sbr.rel (%p2744_p12) target bundleno = 2479 (0x9af), region = 40  ;;  %s1560_s25 = sshll.u32 (!%p2744_p12), %s2528_s15, 4 }
  0x91   : > { %s267_s9 = scalar_lea.sflag (!%p2744_p12), [#allocation3], %s2528_s15  ;;  %s270_s18 = scalar_lea.vmem (!%p2744_p12), [#allocation2], %s1560_s25 }
  0x97   : > { %2203 = dma.done.wait (%p2745_p1), %s267_s9, 256  }
  0x98   : > { %2205 = vsyncadd (%p2745_p1), %s267_s9, 4294967040  ;;  %p2746_p11 = scmp.ne.s32.totalorder %s2733_s26, 0 }
  0x9a   : > { %2207 = dma.done.wait (%p2746_p11), [#allocation6], 1024  }
  0x9b   : > { %2209 = vsyncadd (%p2746_p11), [#allocation6], 4294966272 }
  0x9c   : > { %2211 = dma.done.wait (%p2746_p11), [#allocation9], 1040  }
  0x9d   : > { %2213 = vsyncadd (%p2746_p11), [#allocation9], 4294966256  ;;  %vm320_vm0 = vcmask 261120   ;;  %v316_v0 = vld [vmem:[#allocation5] sm:$0xff]  ;;  %v317_v1 = vld [vmem:[#allocation5 + $0x8] sm:$0xff]  ;;  %vm483_vm1 = vcmask 130048  }
  0x9e   : > { %v318_v2 = vld [vmem:[#allocation5 + $0x10] sm:$0xff]  ;;  %v1755_v3 = vpack.c.bf16 %v317_v1, %v316_v0  ;;  %v319_v4 = vld [vmem:[#allocation5 + $0x18] sm:$0xff]  ;;  %v404_v7 = vld [vmem:[#allocation7] sm:$0xff]  ;;  %s2249_s26 = smov 64   ;;  %s2250_s28 = smov 112   ;;  %vm1308_vm3 = vcmask 392192  }
  0x9f   : > { %v314_v5 = vld [vmem:[%s270_s18] sm:$0xff]  ;;  %v1759_v6 = vpack.c.bf16 %v319_v4, %v318_v2  ;;  %v405_v8 = vld [vmem:[#allocation7 + $0x8] sm:$0xff]  ;;  %v407_v11 = vld [vmem:[#allocation7 + $0x18] sm:$0xff]  ;;  %s2251_s30 = smov 48   ;;  %s2252_s11 = smov 96   ;;  %vm1326_vm4 = vcmask 523264  }
  0xa0   : > { %1666 = vmatprep.mubr.msk.f32.mxu1 %vm320_vm0, %v314_v5  ;;  %1756 = vmatprep.subr.bf16.mxu1 %v1755_v3  ;;  %v1763_v9 = vpack.c.bf16 %v405_v8, %v404_v7  ;;  %v406_v10 = vld [vmem:[#allocation7 + $0x10] sm:$0xff]  ;;  %v315_v12 = vld [vmem:[%s270_s18 + $0x8] sm:$0xff]  ;;  %vm2556_vm2 = vmpackc.low %vm483_vm1, %vm483_vm1  ;;  %s2253_s13 = smov 32   ;;  %s2254_s12 = smov 80  }
  0xa1   : > { %1758 = vmatpush3.bf16.msra.mxu1 %v1755_v3  ;;  %v1767_v13 = vpack.c.bf16 %v407_v11, %v406_v10  ;;  %s2255_s10 = smov 16   ;;  %s312_s29 = scalar_lea.vmem [#allocation11], %s1560_s25 }
  0xa2   : > { %1760 = vmatprep.subr.bf16.mxu1 %v1759_v6  ;;  %s1426_s7 = sshll.u32 %s312_s29, 4  ;;  %s1603_s17 = sshll.u32 %s2232_s21, 8  ;;  %s2664_s7 = int_to_ptr.vmem [resolvable:$true] %s1426_s7 }
  0xa3   : > { %s2669_s14 = scalar_lea.hbm %s2725_s5, %s1603_s17  ;;  %s1411_s25 = scalar_lea.sflag [#allocation4], %s2528_s15 }
  0xa4   : > { %s2150_s21 = scalar_lea.vmem %s2664_s7, 256  ;;  %s2256_s9 = smov [#allocation11]  }
  0xa5   : > { %1762 = vmatpush3.bf16.msra.mxu1 %v1759_v6  ;;  %p2151_p8 = scmp.ne.s32.totalorder %s2664_s7, %s2150_s21  ;;  %s2154_s18 = sshll.u32 %s2256_s9, 4  ;;  %s2155_s18 = int_to_ptr.vmem [resolvable:$false] %s2154_s18 }
  0xa6   : > { %1764 = vmatprep.subr.bf16.mxu1 %v1763_v9  ;;  %p2157_p3 = scmp.lt.s32.totalorder %s2664_s7, %s2155_s18 }
  0xa7   : > { %p2152_p6 = pnand %p2151_p8, %p2470_p5 }
  0xa8   : > { %1667 = vmatmul.mubr.msk.f32.vlgmr.msra.gmra.mrb[0].mxu1 %vm320_vm0, %v315_v12 }
  0xa9   : > { %1766 = vmatpush3.bf16.msra.mxu1 %v1763_v9  ;;  %1677 = vmatprep.mubr.msk.f32.mxu1 %vm320_vm0, %v314_v5  ;;  %p2153_p10 = pneg %p2152_p6 }
  0xaa   : > { %1768 = vmatprep.subr.bf16.mxu1 %v1767_v13 }
  0xad   : > { %1770 = vmatpush3.bf16.msra.mxu1 %v1767_v13 }
  0xb0   : > { %1678 = vmatmul.mubr.msk.f32.vlgmr.msra.gmra.mrb[2].mxu1 %vm320_vm0, %v315_v12 }
 0x17b   : > { %v1668_v14 = vpop.f32.mrb[0].mxu1 }
 0x17c   : > { %v393_v15 = vpop.f32.mrb[1].mxu1  ;;  %v2569_v22 = vmul.f32 0.25, %v1668_v14 }
 0x17d   : > { %v2550_v16 = vmul.f32 0.25, %v393_v15 }
 0x17f   : > { %1684 = vmatprep.mubr.msk.f32.mxu0 %vm483_vm1, %v2550_v16 }
 0x183   : > { %v1679_v17 = vpop.f32.mrb[2].mxu1 }
 0x184   : > { %v474_v18 = vpop.f32.mrb[3].mxu1 }
 0x185   : > { %v2560_v20 = vpack.i.bf16 %v1679_v17, %v474_v18  ;;  %v1771_v21 = vpack.c.bf16 %v1679_v17, %v474_v18 }
 0x187   : > { %1942 = vrot.lane.b32.xlu1 %v2560_v20, %s2249_s26  ;;  %1773 = vmatprep.subr.msk.bf16.mxu0 %vm2556_vm2, %v1771_v21  ;;  %s2156_s26 = scalar_lea.vmem %s2155_s18, 512 }
 0x188   : > { %1776 = vmatpush3.bf16.xpose.msk.msra.mxu0 %vm2556_vm2, %v1771_v21  ;;  %p2158_p7 = scmp.lt.s32.totalorder %s2156_s26, %s2150_s21 }
 0x18a   : > { %p2159_p9 = por %p2158_p7, %p2157_p3 }
 0x18b   : > { %1947 = vrot.lane.b32.xlu1 %v2560_v20, %s2250_s28 }
 0x18c   : > { %p2160_p0 = pnand %p2159_p9, %p2153_p10 }
 0x18f   : > { %682 = vrot.lane.b32.xlu1 %v2569_v22, %s2250_s28  ;;  %1685 = vmatmul.mubr.msk.f32.vlgmr.msra.gmra.mrb[0].mxu0 %vm483_vm1, %v2569_v22 }
 0x193   : > { %1952 = vrot.lane.b32.xlu1 %v2560_v20, %s2251_s30 }
 0x1f9   : > { %v1943_v23 = vpop.permute.xlu1 %1942 }
 0x1fa   : > { %v1945_v24 = vunpack.i.h.bf16 %v1943_v23  ;;  %v1944_v25 = vunpack.i.l.bf16 %v1943_v23 }
 0x1fc   : > { %v1777_v26 = vpack.c.bf16 %v1945_v24, %v1944_v25 }
 0x1fd   : > { %v1948_v27 = vpop.permute.xlu1 %1947 }
 0x1fe   : > { %v1950_v28 = vunpack.i.h.bf16 %v1948_v27  ;;  %v1949_v29 = vunpack.i.l.bf16 %v1948_v27  ;;  %1778 = vmatprep.subr.bf16.mxu1 %v1777_v26 }
 0x1ff   : > { %1780 = vmatpush3.bf16.msra.mxu1 %v1777_v26 }
 0x200   : > { %v1781_v30 = vpack.c.bf16 %v1950_v28, %v1949_v29 }
 0x201   : > { %v683_v31 = vpop.permute.xlu1 %682 }
 0x202   : > { %1783 = vmatprep.subr.msk.bf16.mxu1 %vm2556_vm2, %v1781_v30 }
 0x205   : > { %v1953_v32 = vpop.permute.xlu1 %1952 }
 0x206   : > { %v1955_v33 = vunpack.i.h.bf16 %v1953_v32  ;;  %v1954_v34 = vunpack.i.l.bf16 %v1953_v32 }
 0x208   : > { %v1787_v35 = vpack.c.bf16 %v1955_v33, %v1954_v34 }
 0x20a   : > { %1788 = vmatprep.subr.bf16.mxu0 %v1787_v35 }
 0x20b   : > { %1790 = vmatpush3.bf16.msra.mxu0 %v1787_v35 }
 0x262   : > { %v1686_v36 = vpop.f32.mrb[0].mxu0 }
 0x263   : > { %v562_v37 = vpop.f32.mrb[1].mxu0  ;;  %v574_v39 = vsel %vm483_vm1, %v1686_v36, -inf }
 0x264   : > { %v571_v38 = vsel %vm483_vm1, %v562_v37, -inf }
 0x265   : > { %572 = vmax.xlane.f32.xlu0 %v571_v38 }
 0x269   : > { %575 = vmax.xlane.f32.xlu0 %v574_v39 }
 0x27f   : > { %680 = vrot.lane.b32.xlu0 %v2550_v16, %s2250_s28 }
 0x2f2   : > { %v573_v40 = vpop.xlane.xlu0 %572 }
 0x2f3   : > { %v577_v41 = vsub.f32 %v562_v37, %v573_v40 }
 0x2f5   : > { %v579_v42 = vmul.f32 1.442695, %v577_v41 }
 0x2f6   : > { %v576_v43 = vpop.xlane.xlu0 %575 }
 0x2f7   : > { %1976 = vpow2.f32 %v579_v42  ;;  %v578_v44 = vsub.f32 %v1686_v36, %v576_v43 }
 0x2f9   : > { %v581_v45 = vmul.f32 1.442695, %v578_v44 }
 0x2fa   : > { %v681_v48 = vpop.permute.xlu0 %680 }
 0x2fb   : > { %1978 = vpow2.f32 %v581_v45 }
 0x301   : > { %v2583_v46 = vpop.eup %1976 }
 0x302   : > { %1691 = vmatprep.mubr.msk.f32.mxu1 %vm483_vm1, %v2583_v46 }
 0x305   : > { %v2587_v47 = vpop.eup %1978 }
 0x306   : > { %1692 = vmatmul.mubr.msk.f32.vlgmr.msra.gmra.mrb[4].mxu1 %vm483_vm1, %v2587_v47 }
 0x307   : > { %1786 = vmatpush3.bf16.xpose.msk.msra.mxu1 %vm2556_vm2, %v1781_v30  ;;  %1698 = vmatprep.mubr.msk.f32.mxu1 %vm483_vm1, %v681_v48 }
 0x30e   : > { %1699 = vmatmul.mubr.msk.f32.vlgmr.msra.gmra.mrb[6].mxu1 %vm483_vm1, %v683_v31 }
 0x3d9   : > { %v2595_v49 = vpop.f32.mrb[4].mxu1 }
 0x3da   : > { %v2597_v50 = vpop.f32.mrb[5].mxu1 }
 0x3e1   : > { %v1700_v51 = vpop.f32.mrb[6].mxu1 }
 0x3e2   : > { %v762_v52 = vpop.f32.mrb[7].mxu1  ;;  %v774_v53 = vsel %vm483_vm1, %v1700_v51, -inf }
 0x3e3   : > { %775 = vmax.xlane.f32.xlu0 %v774_v53  ;;  %v771_v54 = vsel %vm483_vm1, %v762_v52, -inf }
 0x3e4   : > { %772 = vmax.xlane.f32.xlu1 %v771_v54 }
 0x3f5   : > { %880 = vrot.lane.b32.xlu1 %v2550_v16, %s2252_s11 }
 0x3f9   : > { %1957 = vrot.lane.b32.xlu0 %v2560_v20, %s2252_s11  ;;  %882 = vrot.lane.b32.xlu1 %v2569_v22, %s2252_s11 }
 0x3fd   : > { %1962 = vrot.lane.b32.xlu1 %v2560_v20, %s2253_s13 }
 0x470   : > { %v776_v55 = vpop.xlane.xlu0 %775 }
 0x471   : > { %v778_v56 = vsub.f32 %v1700_v51, %v776_v55  ;;  %v773_v57 = vpop.xlane.xlu1 %772 }
 0x472   : > { %v777_v58 = vsub.f32 %v762_v52, %v773_v57 }
 0x473   : > { %v781_v59 = vmul.f32 1.442695, %v778_v56 }
 0x474   : > { %v779_v60 = vmul.f32 1.442695, %v777_v58  ;;  %v1958_v61 = vpop.permute.xlu0 %1957 }
 0x475   : > { %v1960_v62 = vunpack.i.h.bf16 %v1958_v61  ;;  %v1959_v63 = vunpack.i.l.bf16 %v1958_v61  ;;  %v881_v0 = vpop.permute.xlu1 %880  ;;  %v583_v61 = vsel %vm483_vm1, %v2583_v46, 0.0 }
 0x476   : > { %1980 = vpow2.f32 %v779_v60 }
 0x477   : > { %1982 = vpow2.f32 %v781_v59  ;;  %v1791_v1 = vpack.c.bf16 %v1960_v62, %v1959_v63  ;;  %v586_v62 = vsel %vm483_vm1, %v2587_v47, 0.0 }
 0x479   : > { %1793 = vmatprep.subr.msk.bf16.mxu0 %vm2556_vm2, %v1791_v1  ;;  %v883_v2 = vpop.permute.xlu1 %882 }
 0x47d   : > { %v1963_v3 = vpop.permute.xlu1 %1962 }
 0x47e   : > { %v1965_v4 = vunpack.i.h.bf16 %v1963_v3  ;;  %v1964_v5 = vunpack.i.l.bf16 %v1963_v3 }
 0x480   : > { %v1981_v6 = vpop.eup %1980  ;;  %v1797_v7 = vpack.c.bf16 %v1965_v4, %v1964_v5  ;;  %v1311_v5 = vld [vmem:[#allocation8] sm:$0xff] }
 0x481   : > { %v1983_v8 = vpop.eup %1982  ;;  %1705 = vmatprep.mubr.msk.f32.mxu0 %vm483_vm1, %v1981_v6  ;;  %v783_v37 = vsel %vm483_vm1, %v1981_v6, 0.0  ;;  %v1312_v6 = vld [vmem:[#allocation8 + $0x8] sm:$0xff] }
 0x482   : > { %1706 = vmatmul.mubr.msk.f32.vlgmr.msra.gmra.mrb[2].mxu0 %vm483_vm1, %v1983_v8  ;;  %1798 = vmatprep.subr.bf16.mxu1 %v1797_v7  ;;  %v786_v19 = vsel %vm483_vm1, %v1983_v8, 0.0  ;;  %v1811_v8 = vpack.c.bf16 %v1312_v6, %v1311_v5 }
 0x483   : > { %1796 = vmatpush3.bf16.xpose.msk.msra.mxu0 %vm2556_vm2, %v1791_v1  ;;  %1712 = vmatprep.mubr.msk.f32.mxu0 %vm483_vm1, %v881_v0 }
 0x484   : > { %1800 = vmatpush3.bf16.msra.mxu1 %v1797_v7  ;;  %v1313_v7 = vld [vmem:[#allocation8 + $0x10] sm:$0xff] }
 0x48a   : > { %1713 = vmatmul.mubr.msk.f32.vlgmr.msra.gmra.mrb[4].mxu0 %vm483_vm1, %v883_v2 }
 0x555   : > { %v2614_v9 = vpop.f32.mrb[2].mxu0 }
 0x556   : > { %v2616_v10 = vpop.f32.mrb[3].mxu0 }
 0x55d   : > { %v1714_v11 = vpop.f32.mrb[4].mxu0 }
 0x55e   : > { %v962_v12 = vpop.f32.mrb[5].mxu0  ;;  %v974_v13 = vsel %vm483_vm1, %v1714_v11, -inf }
 0x55f   : > { %975 = vmax.xlane.f32.xlu0 %v974_v13  ;;  %v971_v14 = vsel %vm483_vm1, %v962_v12, -inf  ;;  %v1315_v13 = vld [vmem:[#allocation8 + $0x20] sm:$0xff] }
 0x560   : > { %972 = vmax.xlane.f32.xlu1 %v971_v14  ;;  %v1316_v14 = vld [vmem:[#allocation8 + $0x28] sm:$0xff] }
 0x571   : > { %1080 = vrot.lane.b32.xlu1 %v2550_v16, %s2254_s12 }
 0x575   : > { %1967 = vrot.lane.b32.xlu0 %v2560_v20, %s2254_s12  ;;  %1082 = vrot.lane.b32.xlu1 %v2569_v22, %s2254_s12 }
 0x5ec   : > { %v976_v15 = vpop.xlane.xlu0 %975 }
 0x5ed   : > { %v978_v17 = vsub.f32 %v1714_v11, %v976_v15  ;;  %v973_v18 = vpop.xlane.xlu1 %972  ;;  %v1314_v11 = vld [vmem:[#allocation8 + $0x18] sm:$0xff]  ;;  %v1317_v15 = vld [vmem:[#allocation8 + $0x30] sm:$0xff] }
 0x5ee   : > { %v977_v21 = vsub.f32 %v962_v12, %v973_v18  ;;  %v1815_v12 = vpack.c.bf16 %v1314_v11, %v1313_v7 }
 0x5ef   : > { %v981_v23 = vmul.f32 1.442695, %v978_v17  ;;  %v1318_v17 = vld [vmem:[#allocation8 + $0x38] sm:$0xff] }
 0x5f0   : > { %v979_v24 = vmul.f32 1.442695, %v977_v21  ;;  %v1968_v25 = vpop.permute.xlu0 %1967  ;;  %v1823_v18 = vpack.c.bf16 %v1318_v17, %v1317_v15 }
 0x5f1   : > { %v1970_v26 = vunpack.i.h.bf16 %v1968_v25  ;;  %v1969_v27 = vunpack.i.l.bf16 %v1968_v25  ;;  %v1081_v22 = vpop.permute.xlu1 %1080 }
 0x5f2   : > { %1984 = vpow2.f32 %v979_v24 }
 0x5f3   : > { %1986 = vpow2.f32 %v981_v23  ;;  %v1801_v28 = vpack.c.bf16 %v1970_v26, %v1969_v27 }
 0x5f5   : > { %1803 = vmatprep.subr.msk.bf16.mxu1 %vm2556_vm2, %v1801_v28  ;;  %v1083_v30 = vpop.permute.xlu1 %1082 }
 0x5fc   : > { %v1985_v16 = vpop.eup %1984 }
 0x5fd   : > { %v1987_v29 = vpop.eup %1986  ;;  %1719 = vmatprep.mubr.msk.f32.mxu1 %vm483_vm1, %v1985_v16  ;;  %v983_v38 = vsel %vm483_vm1, %v1985_v16, 0.0 }
 0x5fe   : > { %1720 = vmatmul.mubr.msk.f32.vlgmr.msra.gmra.mrb[8].mxu1 %vm483_vm1, %v1987_v29  ;;  %v986_v39 = vsel %vm483_vm1, %v1987_v29, 0.0 }
 0x5ff   : > { %1806 = vmatpush3.bf16.xpose.msk.msra.mxu1 %vm2556_vm2, %v1801_v28  ;;  %1726 = vmatprep.mubr.msk.f32.mxu1 %vm483_vm1, %v1081_v22 }
 0x606   : > { %1727 = vmatmul.mubr.msk.f32.vlgmr.msra.gmra.mrb[10].mxu1 %vm483_vm1, %v1083_v30 }
 0x6d1   : > { %v1721_v31 = vpop.f32.mrb[8].mxu1 }
 0x6d2   : > { %v1067_v32 = vpop.f32.mrb[9].mxu1 }
 0x6d9   : > { %v1728_v33 = vpop.f32.mrb[10].mxu1 }
 0x6da   : > { %v1162_v34 = vpop.f32.mrb[11].mxu1  ;;  %v1174_v35 = vsel %vm483_vm1, %v1728_v33, -inf }
 0x6db   : > { %1175 = vmax.xlane.f32.xlu0 %v1174_v35  ;;  %v1171_v36 = vsel %vm483_vm1, %v1162_v34, -inf }
 0x6dc   : > { %1172 = vmax.xlane.f32.xlu1 %v1171_v36 }
 0x6e0   : > { %784 = vadd.xlane.f32.xlu1 %v783_v37 }
 0x6e4   : > { %787 = vadd.xlane.f32.xlu1 %v786_v19 }
 0x6e8   : > { %984 = vadd.xlane.f32.xlu1 %v983_v38 }
 0x6ec   : > { %987 = vadd.xlane.f32.xlu1 %v986_v39 }
 0x6f1   : > { %1972 = vrot.lane.b32.xlu0 %v2560_v20, %s2255_s10 }
 0x768   : > { %v1176_v40 = vpop.xlane.xlu0 %1175 }
 0x769   : > { %v1178_v41 = vsub.f32 %v1728_v33, %v1176_v40  ;;  %v1173_v42 = vpop.xlane.xlu1 %1172 }
 0x76a   : > { %v1177_v43 = vsub.f32 %v1162_v34, %v1173_v42 }
 0x76b   : > { %v1181_v44 = vmul.f32 1.442695, %v1178_v41 }
 0x76c   : > { %v1179_v45 = vmul.f32 1.442695, %v1177_v43  ;;  %v1973_v48 = vpop.permute.xlu0 %1972 }
 0x76d   : > { %1988 = vpow2.f32 %v1181_v44  ;;  %v1975_v51 = vunpack.i.h.bf16 %v1973_v48  ;;  %v1974_v52 = vunpack.i.l.bf16 %v1973_v48  ;;  %v785_v53 = vpop.xlane.xlu1 %784 }
 0x76e   : > { %1990 = vpow2.f32 %v1179_v45 }
 0x76f   : > { %v1807_v54 = vpack.c.bf16 %v1975_v51, %v1974_v52 }
 0x771   : > { %1808 = vmatprep.subr.bf16.mxu0 %v1807_v54  ;;  %v788_v55 = vpop.xlane.xlu1 %787 }
 0x772   : > { %1810 = vmatpush3.bf16.msra.mxu0 %v1807_v54 }
 0x773   : > { %1812 = vmatprep.subr.bf16.mxu0 %v1811_v8 }
 0x775   : > { %v985_v57 = vpop.xlane.xlu1 %984 }
 0x777   : > { %v1989_v56 = vpop.eup %1988 }
 0x778   : > { %v1991_v58 = vpop.eup %1990  ;;  %v1186_v20 = vsel %vm483_vm1, %v1989_v56, 0.0 }
 0x779   : > { %1187 = vadd.xlane.f32.xlu0 %v1186_v20  ;;  %1733 = vmatprep.mubr.msk.f32.mxu0 %vm483_vm1, %v1991_v58  ;;  %v1183_v59 = vsel %vm483_vm1, %v1991_v58, 0.0  ;;  %v988_v60 = vpop.xlane.xlu1 %987 }
 0x77a   : > { %1734 = vmatmul.mubr.msk.f32.vlgmr.msra.gmra.mrb[6].mxu0 %vm483_vm1, %v1989_v56  ;;  %1184 = vadd.xlane.f32.xlu1 %v1183_v59  ;;  %1992 = vrcp.f32 %v988_v60 }
 0x77b   : > { %1994 = vrcp.f32 %v785_v53  ;;  %1814 = vmatpush3.bf16.msra.mxu0 %v1811_v8 }
 0x77c   : > { %1996 = vrcp.f32 %v788_v55  ;;  %1816 = vmatprep.subr.bf16.mxu0 %v1815_v12 }
 0x77d   : > { %1998 = vrcp.f32 %v985_v57 }
 0x77e   : > { %584 = vadd.xlane.f32.xlu1 %v583_v61 }
 0x77f   : > { %1818 = vmatpush3.bf16.msra.mxu0 %v1815_v12 }
 0x782   : > { %587 = vadd.xlane.f32.xlu1 %v586_v62 }
 0x784   : > { %v1993_v63 = vpop.eup %1992 }
 0x785   : > { %v1079_v0 = vmul.f32 %v1993_v63, %v1721_v31  ;;  %v1995_v1 = vpop.eup %1994 }
 0x786   : > { %v878_v2 = vmul.f32 %v1995_v1, %v2616_v10  ;;  %v1997_v3 = vpop.eup %1996  ;;  %v1819_v10 = vpack.c.bf16 %v1316_v14, %v1315_v13 }
 0x787   : > { %v879_v46 = vmul.f32 %v1997_v3, %v2614_v9  ;;  %v1999_v4 = vpop.eup %1998 }
 0x788   : > { %v1078_v47 = vmul.f32 %v1999_v4, %v1067_v32  ;;  %1820 = vmatprep.subr.bf16.mxu0 %v1819_v10 }
 0x789   : > { %1822 = vmatpush3.bf16.msra.mxu0 %v1819_v10 }
 0x78a   : > { %1824 = vmatprep.subr.bf16.mxu0 %v1823_v18 }
 0x78d   : > { %1826 = vmatpush3.bf16.msra.mxu0 %v1823_v18 }
 0x78f   : > { %1292 = vrot.lane.b32.xlu0 %v1079_v0, %s2253_s13 }
 0x793   : > { %1282 = vrot.lane.b32.xlu1 %v878_v2, %s2255_s10 }
 0x797   : > { %1284 = vrot.lane.b32.xlu1 %v879_v46, %s2255_s10 }
 0x79b   : > { %1290 = vrot.lane.b32.xlu1 %v1078_v47, %s2253_s13 }
 0x806   : > { %v1188_v21 = vpop.xlane.xlu0 %1187 }
 0x807   : > { %v1185_v9 = vpop.xlane.xlu1 %1184 }
 0x808   : > { %2000 = vrcp.f32 %v1185_v9 }
 0x809   : > { %2002 = vrcp.f32 %v1188_v21 }
 0x80a   : > { %v1293_v40 = vpop.permute.xlu0 %1292 }
 0x80b   : > { %v585_v16 = vpop.xlane.xlu1 %584 }
 0x80c   : > { %2004 = vrcp.f32 %v585_v16 }
 0x80f   : > { %v588_v29 = vpop.xlane.xlu1 %587 }
 0x810   : > { %2006 = vrcp.f32 %v588_v29 }
 0x812   : > { %v2001_v24 = vpop.eup %2000 }
 0x813   : > { %v2003_v27 = vpop.eup %2002  ;;  %v1283_v22 = vpop.permute.xlu1 %1282 }
 0x816   : > { %v2005_v31 = vpop.eup %2004 }
 0x817   : > { %v1285_v30 = vpop.permute.xlu1 %1284  ;;  %v678_v33 = vmul.f32 %v2005_v31, %v2597_v50 }
 0x819   : > { %v1304_v36 = vsel %vm483_vm1, %v678_v33, %v1283_v22 }
 0x81a   : > { %v2007_v32 = vpop.eup %2006 }
 0x81b   : > { %v1291_v34 = vpop.permute.xlu1 %1290  ;;  %v679_v35 = vmul.f32 %v2007_v32, %v2595_v49  ;;  %v1594_v49 = vld [vmem:[#allocation10] ss:$0 sm:$0xff] }
 0x81c   : > { %v1306_v37 = vsel %vm320_vm0, %v1304_v36, %v1291_v34 }
 0x81d   : > { %v1305_v38 = vsel %vm483_vm1, %v679_v35, %v1285_v30 }
 0x81e   : > { %v1307_v41 = vsel %vm320_vm0, %v1305_v38, %v1293_v40 }
 0x84d   : > { %v1735_v23 = vpop.f32.mrb[6].mxu0 }
 0x84e   : > { %v1267_v25 = vpop.f32.mrb[7].mxu0  ;;  %v1279_v28 = vmul.f32 %v2003_v27, %v1735_v23 }
 0x84f   : > { %v1278_v26 = vmul.f32 %v2001_v24, %v1267_v25 }
 0x851   : > { %1298 = vrot.lane.b32.xlu1 %v1278_v26, %s2251_s30 }
 0x855   : > { %1300 = vrot.lane.b32.xlu1 %v1279_v28, %s2251_s30 }
 0x8c3   : > { %v1299_v19 = vpop.permute.xlu1 %1298 }
 0x8c4   : > { %v1309_v39 = vsel %vm1308_vm3, %v1306_v37, %v1299_v19 }
 0x8c5   : > { %1752 = vmatprep.mubr.msk.f32.mxu0 %vm1326_vm4, %v1309_v39 }
 0x8c7   : > { %v1301_v50 = vpop.permute.xlu1 %1300 }
 0x8c8   : > { %v1310_v42 = vsel %vm1308_vm3, %v1307_v41, %v1301_v50 }
 0x8c9   : > { %1753 = vmatmul.mubr.msk.f32.vlgmr.msra.gmra.mrb[8].mxu0 %vm1326_vm4, %v1310_v42 }
 0x99c   : > { %v1754_v43 = vpop.f32.mrb[8].mxu0 }
 0x99d   : > { %v1405_v44 = vadd.f32 %v1754_v43, %v1594_v49  ;;  %v1399_v45 = vpop.f32.mrb[9].mxu0 }
 0x99e   : > { %v1400_v48 = vadd.f32 %v1594_v49, %v1399_v45 }
 0x99f   : > { %1409 = vst.msk [vmem:[%s312_s29 + $0x8] sm:$0xff] %vm320_vm0, %v1405_v44 }
 0x9a0   : > { %1408 = vst.msk [vmem:[%s312_s29] sm:$0xff] %vm320_vm0, %v1400_v48 }
 0x9a1   : > { %2163 = shalt.err (!%p2160_p0)
}
 0x9a2   : > { %s2164_s28 = scalar_lea.hbm %s2669_s14, 256  ;;  %s2168_s13 = scalar_lea.hbm %s2725_s5, 512 }
 0x9a3   : > { %p2165_p4 = scmp.ne.s32.totalorder %s2669_s14, %s2164_s28  ;;  %p2169_p12 = scmp.lt.u32.totalorder %s2669_s14, %s2725_s5 }
 0x9a4   : > { %p2170_p1 = scmp.lt.u32.totalorder %s2168_s13, %s2164_s28  ;;  %p2172_p8 = scmp.lt.u32.totalorder %s2164_s28, %s2669_s14 }
 0x9a5   : > { %p2166_p13 = pnand %p2165_p4, %p2470_p5 }
 0x9a6   : > { %p2171_p11 = por %p2170_p1, %p2169_p12 }
 0x9a7   : > { %p2167_p2 = pneg %p2166_p13 }
 0x9a8   : > { %p2173_p6 = por %p2172_p8, %p2171_p11 }
 0x9aa   : > { %p2174_p10 = pnand %p2173_p6, %p2167_p2 }
 0x9ac   : > { %2177 = shalt.err (!%p2174_p10)
}
 0x9ad   : > { %s2257_s29 = smov 128   ;;  %s2258_s17 = smov 8  }
 0x9ae   : > { %1845 = dma.vmem_to_hbm [thread:$0]  (%p2470_p5), %s2664_s7, 256, %s2669_s14, %s1411_s25, %s2257_s29, %s2257_s29, %s2258_s17  }
 0x9af PF: > { %s2749_s27 = sld [smem:[#allocation16_spill]]  ;;  %s2750_s16 = sld [smem:[#allocation17_spill]] }
 0x9b0   : > { %p2752_p7 = scmp.ge.s32.totalorder %s2240_s23, 2 }
 0x9b5   : > { %s1441_s21 = sand.u32 1, %s2749_s27   ;;  %p2751_p3 = scmp.ne.s32.totalorder %s2750_s16, 0 }
 0x9b6   : > { %s1442_s9 = scalar_lea.sflag [#allocation4], %s1441_s21 }
 0x9b7   : > { %p1865_p9 = pnand %p2752_p7, %p2751_p3 }
 0x9b9   : > { %2215 = dma.done.wait (!%p1865_p9), %s1442_s9, 256  }
 0x9ba   : > { %2217 = vsyncadd (!%p1865_p9), %s1442_s9, 4294967040  ;;  %s23_s23 = sadd.s32 1, %s2240_s23   ;;  %s2753_s18 = smov %s2224_s19 }
 0x9bb   : > { %p20_p0 = scmp.ge.s32.totalorder %s23_s23, 4   ;;  %s2754_s19 = smov %s2228_s20 }
 0x9bc   : > { %s2755_s20 = smov %s2479_s6  ;;  %s2756_s21 = smov %s2236_s22 }
 0x9bd   : > { %s2757_s22 = smov %s2759_s24  ;;  %22 = sbr.rel (!%p20_p0) target bundleno = 8 (0x8), region = 101 }
 0x9c4   :  { %1447 = vsyncpa [#allocation3], 1 }
 0x9c5   :  { %1449 = vsyncpa [#allocation3 + $0x1], 1 }
 0x9c6   :  { %1450 = vsyncpa [#allocation6], 1 }
 0x9c7   :  { %1451 = vsyncpa [#allocation9], 1 }
 0x9c8   :  { %1452 = vsyncpa [#allocation4], 1 }
 0x9c9   :  { %1454 = vsyncpa [#allocation4 + $0x1], 1 }

</bundles_post_ra>
